<compile_context>
chip_gen: v5e
topology: v5e:2x2
jax: 0.10.0
libtpu: 0.0.40
codegen_flags: <defaults>
</compile_context>

<pallas_src>
import jax
import jax.numpy as jnp
from jax.experimental import pallas as pl
from jax.experimental.pallas import tpu as pltpu

EPS = 1e-5


def _round_up(x, m):
    return ((x + m - 1) // m) * m


def _vmem_capacity_bytes():
    try:
        cap = getattr(pltpu.get_tpu_info(), "vmem_capacity_bytes", None)
        if cap:
            return int(cap)
    except Exception:
        pass
    return 64 * 1024 * 1024  # conservative fallback (v7x per-TC VMEM)


def _stats_kernel(x_ref, sum_ref, sq_ref):
    """Accumulate per-lane sum(x) and sum(x*x) across the row (N) grid axis."""
    @pl.when(pl.program_id(1) == 0)
    def _():
        sum_ref[...] = jnp.zeros_like(sum_ref)
        sq_ref[...] = jnp.zeros_like(sq_ref)

    x = x_ref[...].astype(jnp.float32)          # upcast on load, per block
    sum_ref[...] += jnp.sum(x, axis=0, keepdims=True)
    sq_ref[...] += jnp.sum(x * x, axis=0, keepdims=True)


def _apply_kernel(x_ref, scale_ref, shift_ref, o_ref):
    x = x_ref[...].astype(jnp.float32)
    o_ref[...] = (x * scale_ref[...] + shift_ref[...]).astype(o_ref.dtype)


def satzilla_encoder(sat_feats, gamma, beta, *, lane_tile=512, row_tile=None):
    """BatchNorm1d(in_dim) forward with training-mode batch statistics.

    sat_feats: (N, C); gamma, beta: (C,).  Returns (N, C) in sat_feats.dtype.
    """
    n, c = sat_feats.shape
    assert gamma.shape == (c,) and beta.shape == (c,)
    out_dtype = sat_feats.dtype

    # ---- Lane layout: pack narrow C into all 128 lanes, else pad C up. ----
    if c < 128 and 128 % c == 0:
        pack = 128 // c                 # lane j holds feature j % c
        lanes = 128
    else:
        pack = 1
        lanes = _round_up(c, 128)       # pad ragged C -> lane-dense stores

    x2d = sat_feats
    if pack > 1:
        n_rnd = _round_up(n, pack)
        if n_rnd != n:
            x2d = jnp.pad(x2d, ((0, n_rnd - n), (0, 0)))
        x2d = x2d.reshape(n_rnd // pack, lanes)
    elif lanes != c:
        x2d = jnp.pad(x2d, ((0, 0), (0, lanes - c)))
    rows = x2d.shape[0]

    # ---- Generation-aware tile sizes (v5e/v6e 128 MiB VMEM, v7x 64 MiB). ----
    vmem_cap = _vmem_capacity_bytes()
    budget_x = max(vmem_cap // 10, 1 << 20)      # per-x-block budget
    tl = max(128, (min(lane_tile, lanes) // 128) * 128)
    while lanes % tl != 0:
        tl -= 128
    itemsize = max(jnp.dtype(sat_feats.dtype).itemsize, 4)   # f32 upcast worst case
    tr = budget_x // (tl * itemsize)
    tr = max(8, min((tr // 8) * 8, 1024))
    if row_tile is not None:
        tr = max(8, min(tr, (row_tile // 8) * 8))
    tr = min(tr, _round_up(rows, 8))
    rows_pad = _round_up(rows, tr)
    if rows_pad != rows:
        x2d = jnp.pad(x2d, ((0, rows_pad - rows), (0, 0)))

    grid = (lanes // tl, rows_pad // tr)
    vmem_limit = max(32 * 1024 * 1024, vmem_cap // 2)

    # ---- Phase 1: per-lane sum / sum-of-squares (fused single sweep). ----
    lane_sum, lane_sq = pl.pallas_call(
        _stats_kernel,
        out_shape=(jax.ShapeDtypeStruct((1, lanes), jnp.float32),
                   jax.ShapeDtypeStruct((1, lanes), jnp.float32)),
        grid=grid,
        in_specs=[pl.BlockSpec((tr, tl), lambda j, i: (i, j))],
        out_specs=(pl.BlockSpec((1, tl), lambda j, i: (0, j)),
                   pl.BlockSpec((1, tl), lambda j, i: (0, j))),
        compiler_params=pltpu.CompilerParams(
            dimension_semantics=("parallel", "arbitrary"),
            vmem_limit_bytes=vmem_limit,
        ),
    )(x2d)

    # ---- Tiny C-element glue: lanes -> features, stats, folded affine. ----
    if pack > 1:
        feat_sum = lane_sum.reshape(pack, c).sum(axis=0)
        feat_sq = lane_sq.reshape(pack, c).sum(axis=0)
    else:
        feat_sum = lane_sum[0, :c]
        feat_sq = lane_sq[0, :c]
    inv_n = 1.0 / n                                   # true N (zero-padding safe)
    mean = feat_sum * inv_n
    var = jnp.maximum(feat_sq * inv_n - mean * mean, 0.0)   # biased variance
    scale = gamma.astype(jnp.float32) * jax.lax.rsqrt(var + EPS)
    shift = beta.astype(jnp.float32) - mean * scale

    if pack > 1:
        scale_l = jnp.tile(scale.reshape(1, c), (1, pack))   # lane j -> feat j % c
        shift_l = jnp.tile(shift.reshape(1, c), (1, pack))
    else:
        scale_l = jnp.pad(scale, (0, lanes - c)).reshape(1, lanes)
        shift_l = jnp.pad(shift, (0, lanes - c)).reshape(1, lanes)

    # ---- Phase 2: y = x*scale + shift (lane-dense, fully parallel grid). ----
    out2d = pl.pallas_call(
        _apply_kernel,
        out_shape=jax.ShapeDtypeStruct((rows_pad, lanes), out_dtype),
        grid=grid,
        in_specs=[pl.BlockSpec((tr, tl), lambda j, i: (i, j)),
                  pl.BlockSpec((1, tl), lambda j, i: (0, j)),
                  pl.BlockSpec((1, tl), lambda j, i: (0, j))],
        out_specs=pl.BlockSpec((tr, tl), lambda j, i: (i, j)),
        compiler_params=pltpu.CompilerParams(
            dimension_semantics=("parallel", "parallel"),
            vmem_limit_bytes=vmem_limit,
        ),
    )(x2d, scale_l, shift_l)

    if pack > 1:
        return out2d[:rows].reshape(rows * pack, c)[:n]
    return out2d[:n, :c]


def _ref_batchnorm(x, gamma, beta):
    x32 = x.astype(jnp.float32)
    mean = jnp.mean(x32, axis=0, keepdims=True)
    var = jnp.mean((x32 - mean) ** 2, axis=0, keepdims=True)
    y = (x32 - mean) * jax.lax.rsqrt(var + EPS) * gamma[None, :].astype(jnp.float32) \
        + beta[None, :].astype(jnp.float32)
    return y.astype(x.dtype)


if __name__ == "__main__":
    key = jax.random.PRNGKey(0)
    ks = jax.random.split(key, 9)

    # 1) Real SATzilla-style feature dim C=32 -> packed lane-dense path.
    #    N=10 is not a multiple of the pack factor (4), exercising row padding.
    n1, c1 = 10, 32
    x1 = jax.random.normal(ks[0], (n1, c1), jnp.float32) * 3.0 + 1.5
    g1 = 1.0 + 0.1 * jax.random.normal(ks[1], (c1,), jnp.float32)
    b1 = 0.1 * jax.random.normal(ks[2], (c1,), jnp.float32)
    o1 = jax.block_until_ready(satzilla_encoder(x1, g1, b1))
    assert o1.shape == (n1, c1)
    assert jnp.allclose(o1, _ref_batchnorm(x1, g1, b1), atol=1e-4, rtol=1e-4)

    # 2) Wide feature dim (multiple of 128) -> lane-tiled path, 2 lane tiles.
    n2, c2 = 16, 256
    x2 = jax.random.normal(ks[3], (n2, c2), jnp.float32)
    g2 = 1.0 + 0.1 * jax.random.normal(ks[4], (c2,), jnp.float32)
    b2 = 0.1 * jax.random.normal(ks[5], (c2,), jnp.float32)
    o2 = jax.block_until_ready(satzilla_encoder(x2, g2, b2, lane_tile=128))
    assert o2.shape == (n2, c2)
    assert jnp.allclose(o2, _ref_batchnorm(x2, g2, b2), atol=1e-4, rtol=1e-4)

    # 3) Ragged C (padded to 128 lanes) + forced small row tile so the stats
    #    pass accumulates across several "arbitrary" N-grid steps.
    n3, c3 = 100, 48
    x3 = jax.random.normal(ks[6], (n3, c3), jnp.float32) * 2.0 - 0.5
    g3 = 1.0 + 0.1 * jax.random.normal(ks[7], (c3,), jnp.float32)
    b3 = 0.1 * jax.random.normal(ks[8], (c3,), jnp.float32)
    o3 = jax.block_until_ready(satzilla_encoder(x3, g3, b3, row_tile=16))
    assert o3.shape == (n3, c3)
    assert jnp.allclose(o3, _ref_batchnorm(x3, g3, b3), atol=1e-4, rtol=1e-4)

    print("KERNEL_OK")
</pallas_src>

<mosaic_0001>
module attributes {stable_mosaic.version = 11 : i64} {
  func.func @_stats_kernel(%arg0: i32, %arg1: i32, %arg2: memref<8x128xf32, #tpu.memory_space<vmem>>, %arg3: memref<1x128xf32, #tpu.memory_space<vmem>>, %arg4: memref<1x128xf32, #tpu.memory_space<vmem>>) attributes {dimension_semantics = [#tpu.dimension_semantics<parallel>, #tpu.dimension_semantics<arbitrary>], iteration_bounds = array<i64: 1, 1>, scalar_prefetch = 0 : i64, scratch_operands = 0 : i64, tpu.core_type = #tpu.core_type<tc>, window_params = [{transform_indices = @transform_0, window_bounds = array<i64: 8, 128>}, {transform_indices = @transform_1, window_bounds = array<i64: 1, 128>}, {transform_indices = @transform_2, window_bounds = array<i64: 1, 128>}]} {
    %c0_i32 = arith.constant 0 : i32
    %0 = arith.cmpi eq, %arg1, %c0_i32 : i32
    %1 = arith.extui %0 : i1 to i32
    %c0_i32_0 = arith.constant 0 : i32
    %2 = arith.cmpi ne, %1, %c0_i32_0 : i32
    scf.if %2 {
      %cst_11 = arith.constant 0.000000e+00 : f32
      %15 = vector.broadcast %cst_11 : f32 to vector<1x128xf32>
      %c0_12 = arith.constant 0 : index
      %c0_13 = arith.constant 0 : index
      %16 = vector.load %arg3[%c0_12, %c0_13] : memref<1x128xf32, #tpu.memory_space<vmem>>, vector<1x128xf32>
      tpu.vector_store %arg3[%c0_12, %c0_13], %15 {strides = array<i32>} : memref<1x128xf32, #tpu.memory_space<vmem>>, vector<1x128xf32>,
      %cst_14 = arith.constant 0.000000e+00 : f32
      %17 = vector.broadcast %cst_14 : f32 to vector<1x128xf32>
      %c0_15 = arith.constant 0 : index
      %c0_16 = arith.constant 0 : index
      %18 = vector.load %arg4[%c0_15, %c0_16] : memref<1x128xf32, #tpu.memory_space<vmem>>, vector<1x128xf32>
      tpu.vector_store %arg4[%c0_15, %c0_16], %17 {strides = array<i32>} : memref<1x128xf32, #tpu.memory_space<vmem>>, vector<1x128xf32>,
    } else {
    }
    %c0 = arith.constant 0 : index
    %c0_1 = arith.constant 0 : index
    %3 = vector.load %arg2[%c0, %c0_1] : memref<8x128xf32, #tpu.memory_space<vmem>>, vector<8x128xf32>
    %c0_2 = arith.constant 0 : index
    %c0_3 = arith.constant 0 : index
    %4 = vector.load %arg3[%c0_2, %c0_3] : memref<1x128xf32, #tpu.memory_space<vmem>>, vector<1x128xf32>
    %cst = arith.constant dense<0.000000e+00> : vector<128xf32>
    %5 = vector.multi_reduction <add>, %3, %cst [0] : vector<8x128xf32> to vector<128xf32>
    %6 = vector.shape_cast %5 : vector<128xf32> to vector<1x128xf32>
    %7 = arith.addf %4, %6 : vector<1x128xf32>
    %c0_4 = arith.constant 0 : index
    %c0_5 = arith.constant 0 : index
    %8 = vector.load %arg3[%c0_4, %c0_5] : memref<1x128xf32, #tpu.memory_space<vmem>>, vector<1x128xf32>
    tpu.vector_store %arg3[%c0_4, %c0_5], %7 {strides = array<i32>} : memref<1x128xf32, #tpu.memory_space<vmem>>, vector<1x128xf32>,
    %c0_6 = arith.constant 0 : index
    %c0_7 = arith.constant 0 : index
    %9 = vector.load %arg4[%c0_6, %c0_7] : memref<1x128xf32, #tpu.memory_space<vmem>>, vector<1x128xf32>
    %10 = arith.mulf %3, %3 : vector<8x128xf32>
    %cst_8 = arith.constant dense<0.000000e+00> : vector<128xf32>
    %11 = vector.multi_reduction <add>, %10, %cst_8 [0] : vector<8x128xf32> to vector<128xf32>
    %12 = vector.shape_cast %11 : vector<128xf32> to vector<1x128xf32>
    %13 = arith.addf %9, %12 : vector<1x128xf32>
    %c0_9 = arith.constant 0 : index
    %c0_10 = arith.constant 0 : index
    %14 = vector.load %arg4[%c0_9, %c0_10] : memref<1x128xf32, #tpu.memory_space<vmem>>, vector<1x128xf32>
    tpu.vector_store %arg4[%c0_9, %c0_10], %13 {strides = array<i32>} : memref<1x128xf32, #tpu.memory_space<vmem>>, vector<1x128xf32>,
    return
  }
  func.func @transform_0(%arg0: i32, %arg1: i32) -> (i32, i32) {
    %c0_i32 = arith.constant 0 : i32
    return %arg1, %arg0 : i32, i32
  }
  func.func @transform_1(%arg0: i32, %arg1: i32) -> (i32, i32) {
    %c0_i32 = arith.constant 0 : i32
    %c0_i32_0 = arith.constant 0 : i32
    return %c0_i32, %arg0 : i32, i32
  }
  func.func @transform_2(%arg0: i32, %arg1: i32) -> (i32, i32) {
    %c0_i32 = arith.constant 0 : i32
    %c0_i32_0 = arith.constant 0 : i32
    return %c0_i32, %arg0 : i32, i32
  }
}

</mosaic_0001>

<bundles_post_ra>
// kernel: tpu_custom_call.1
= control target key start
LH: loop header
LB: loop body
LE: loop exit
PB: predicated region body
PF: predicated region fallthrough
CT: control target
= control target key end

     0   :  { %8 = vsyncpa [#allocation3], 0  ;;  %s195_s0 = inlined_call_operand.hbm [shape: f32[8,128], index: 0, kind: input, shape index: {}]   ;;  %s196_s1 = inlined_call_operand.hbm [shape: f32[1,128], index: 1, kind: output, shape index: {0}]   ;;  %s197_s2 = inlined_call_operand.hbm [shape: f32[1,128], index: 2, kind: output, shape index: {1}]  }
   0x1   :  { %9 = vsyncpa [#allocation4], 0 }
   0x2   :  { %10 = vsyncpa [#allocation7], 0  ;;  %s16_s11 = sshll.u32 %s195_s0, 4  ;;  %s167_s12 = smov [#allocation2]   ;;  %s17_s11 = int_to_ptr.hbm [resolvable:$true] %s16_s11 }
   0x3   :  { %s18_s13 = sshll.u32 %s167_s12, 4  ;;  %s19_s13 = int_to_ptr.vmem [resolvable:$true] %s18_s13 }
   0x4   :  { %21 = dma.hbm_to_vmem [thread:$0]  %s17_s11, 128, %s19_s13, [#allocation3]  }
   0x5   :  { %161 = dma.done.wait [#allocation3], 128  }
   0x6   :  { %162 = vsyncadd [#allocation3], 4294967168  ;;  %v168_v0 = vmov 0.0   ;;  %v32_v1 = vld [vmem:[#allocation2] sm:$0xff]  ;;  %s169_s0 = smov [#allocation5]   ;;  %s59_s17 = sshll.u32 %s196_s1, 4  ;;  %s60_s17 = int_to_ptr.hbm [resolvable:$true] %s59_s17 }
   0x7   :  { %30 = vst [vmem:[#allocation5] sm:$0x1] %v168_v0  ;;  %v34_v2 = vrot.slane %v32_v1, 4  ;;  %v43_v3 = vmul.f32 %v32_v1, %v32_v1  ;;  %s57_s14 = sshll.u32 %s169_s0, 4  ;;  %s170_s18 = smov [#allocation6]   ;;  %s58_s14 = int_to_ptr.vmem [resolvable:$true] %s57_s14 }
   0x8   :  { %31 = vst [vmem:[#allocation6] sm:$0x1] %v168_v0  ;;  %s68_s19 = sshll.u32 %s170_s18, 4  ;;  %s70_s22 = sshll.u32 %s197_s2, 4  ;;  %s69_s19 = int_to_ptr.vmem [resolvable:$true] %s68_s19  ;;  %s71_s22 = int_to_ptr.hbm [resolvable:$true] %s70_s22 }
   0x9   :  { %v35_v4 = vadd.f32 %v34_v2, %v32_v1  ;;  %v44_v5 = vrot.slane %v43_v3, 4 }
   0xb   :  { %v36_v6 = vrot.slane %v35_v4, 2  ;;  %v45_v7 = vadd.f32 %v44_v5, %v43_v3 }
   0xd   :  { %v37_v8 = vadd.f32 %v36_v6, %v35_v4  ;;  %v46_v9 = vrot.slane %v45_v7, 2 }
   0xe   :  { %v33_v12 = vld [vmem:[#allocation5] sm:$0x1] }
   0xf   :  { %v38_v10 = vrot.slane %v37_v8, 1  ;;  %v47_v11 = vadd.f32 %v46_v9, %v45_v7  ;;  %v42_v15 = vld [vmem:[#allocation6] sm:$0x1] }
  0x11   :  { %v39_v13 = vadd.f32 %v38_v10, %v37_v8  ;;  %v48_v14 = vrot.slane %v47_v11, 1 }
  0x13   :  { %v40_v16 = vadd.f32 %v39_v13, %v33_v12  ;;  %v49_v17 = vadd.f32 %v48_v14, %v47_v11 }
  0x15   :  { %41 = vst [vmem:[#allocation5] sm:$0x1] %v40_v16  ;;  %v50_v18 = vadd.f32 %v49_v17, %v42_v15 }
  0x16   :  { %62 = dma.vmem_to_hbm [thread:$0]  %s58_s14, 16, %s60_s17, [#allocation4]  }
  0x17   :  { %51 = vst [vmem:[#allocation6] sm:$0x1] %v50_v18 }
  0x18   :  { %73 = dma.vmem_to_hbm [thread:$0]  %s69_s19, 16, %s71_s22, [#allocation7]  }
  0x19   :  { %163 = dma.done.wait [#allocation4], 16  }
  0x1a   :  { %164 = vsyncadd [#allocation4], 4294967280 }
  0x1b   :  { %165 = dma.done.wait [#allocation7], 16  }
  0x1c   :  { %166 = vsyncadd [#allocation7], 4294967280 }
  0x1d   :  { %82 = vsyncpa [#allocation3], 1 }
  0x1e   :  { %83 = vsyncpa [#allocation4], 1 }
  0x1f   :  { %84 = vsyncpa [#allocation7], 1 }

</bundles_post_ra>
